<compile_context>
chip_gen: v5e
topology: v5e:2x2
jax: 0.10.0
libtpu: 0.0.40
codegen_flags: <defaults>
</compile_context>

<pallas_src>
import functools

import jax
import jax.numpy as jnp
from jax.experimental import pallas as pl
from jax.experimental.pallas import tpu as pltpu

HIDDEN = 64                      # cfg.gnn.dim / cfg.gnn.dim_edge == 64
LANE_WIDTH = 128                 # vreg lane width
ROW_TILE = 2048                  # packed rows per grid step (multiple of 16)
VMEM_LIMIT_BYTES = 32 * 1024 * 1024


def _choose_pack(n, din):
    """Largest P <= 128//din that divides n.

    Divisibility keeps both the input packing reshape (N, din)->(N/P, P*din)
    and the output un-packing reshape (N/P, P*64)->(N, 64) free row-major
    views: no wrapper pad, no output slice (each would be a full extra HBM
    read+write of the array).  Worst case (e.g. prime N) P=1 == the unpacked
    layout, which is still correct.
    """
    p_max = max(1, min(LANE_WIDTH // max(din, 1), n))
    for p in range(p_max, 0, -1):
        if n % p == 0:
            return p
    return 1


def _linear_kernel(x_ref, w_ref, b_ref, o_ref):
    """One packed row-tile of y = x @ W_blockdiag + b_tiled.

    MXU dot in the weight dtype (f32 by default -> faithful to the PyTorch
    Linear; bf16 if the caller stored bf16 params), f32 accumulate, f32 bias
    add, store in the output dtype.
    """
    x = x_ref[...].astype(w_ref.dtype)
    acc = jnp.dot(x, w_ref[...], preferred_element_type=jnp.float32)
    o_ref[...] = (acc + b_ref[...]).astype(o_ref.dtype)


def pallas_linear(x, w, b, *, out_dtype=None, row_tile=ROW_TILE):
    """y = x @ w + b via a lane-dense, row-packed Pallas kernel.

    x : (N, din)    f32 or bf16
    w : (din, 64)   nn.Linear.weight.T (f32 by default)
    b : (1, 64)     f32
    out_dtype: output dtype (default: x.dtype).  Pass jnp.bfloat16 to halve
               the dominant HBM write stream when downstream layers accept it.
    """
    n, din = x.shape
    dout = w.shape[1]
    out_dtype = x.dtype if out_dtype is None else out_dtype
    if n == 0:
        return jnp.zeros((0, dout), out_dtype)

    # --- lane-dense packing (free views; see _choose_pack) -----------------
    p = _choose_pack(n, din)
    n_packed = n // p
    x_p = x.reshape(n_packed, p * din)                # free row-major view
    w_p = jnp.kron(jnp.eye(p, dtype=w.dtype), w)      # (p*din, p*dout) block-diag
    b_p = jnp.tile(b, (1, p)).astype(b.dtype)         # (1, p*dout)

    # Tile: full extent for small inputs (always layout-legal), otherwise the
    # big fixed tile (multiple of 16 sublanes, so bf16 inputs stay legal too).
    rt = n_packed if n_packed <= row_tile else row_tile
    grid = (pl.cdiv(n_packed, rt),)   # ragged last block masked by Pallas

    itm_in = jnp.dtype(x.dtype).itemsize
    itm_out = jnp.dtype(out_dtype).itemsize
    cost = pl.CostEstimate(
        flops=2 * n_packed * (p * din) * (p * dout),
        transcendentals=0,
        bytes_accessed=(n * din * itm_in                             # read x
                        + w_p.size * jnp.dtype(w.dtype).itemsize     # read W
                        + b_p.size * jnp.dtype(b.dtype).itemsize     # read b
                        + n * dout * itm_out),                       # write y
    )

    y_p = pl.pallas_call(
        _linear_kernel,
        out_shape=jax.ShapeDtypeStruct((n_packed, p * dout), out_dtype),
        grid_spec=pltpu.PrefetchScalarGridSpec(
            num_scalar_prefetch=0,
            grid=grid,
            in_specs=[
                pl.BlockSpec((rt, p * din), lambda i: (i, 0)),
                # Weight / bias: constant index_map -> fetched once, resident
                # across the whole grid.
                pl.BlockSpec((p * din, p * dout), lambda i: (0, 0)),
                pl.BlockSpec((1, p * dout), lambda i: (0, 0)),
            ],
            out_specs=pl.BlockSpec((rt, p * dout), lambda i: (i, 0)),
        ),
        compiler_params=pltpu.CompilerParams(
            dimension_semantics=("parallel",),
            vmem_limit_bytes=VMEM_LIMIT_BYTES),
        cost_estimate=cost,
    )(x_p, w_p, b_p)

    return y_p.reshape(n, dout)   # free row-major view back to (N, 64)


def init_linear_params(key, dim_in, dim_out, param_dtype=jnp.float32):
    """Init mimicking nn.Linear default (uniform +/- 1/sqrt(dim_in)).

    Weight stored as (dim_in, dim_out) == nn.Linear.weight.T.  Default f32
    (faithful to PyTorch); pass param_dtype=jnp.bfloat16 to trade a little
    precision for halved weight traffic.  Bias stays f32 (f32 VPU add).
    """
    kw, kb = jax.random.split(key)
    bound = 1.0 / jnp.sqrt(jnp.float32(dim_in))
    w = jax.random.uniform(kw, (dim_in, dim_out), jnp.float32, -bound, bound)
    b = jax.random.uniform(kb, (dim_out,), jnp.float32, -bound, bound)
    return w.astype(param_dtype), b.reshape(1, dim_out)


@functools.partial(jax.jit, static_argnames=("out_dtype",))
def _feature_encoder_fwd(node_w, node_b, edge_w, edge_b, x, edge_attr,
                         out_dtype=None):
    # Single dispatch for both projections.  (They still run serially on the
    # TensorCore; at production N that's noise -- see TODO about fusing for
    # latency-critical tiny graphs.)
    return (pallas_linear(x, node_w, node_b, out_dtype=out_dtype),
            pallas_linear(edge_attr, edge_w, edge_b, out_dtype=out_dtype))


class FeatureEncoderPallas:
    """JAX/Pallas port of FraudGT's FeatureEncoder (homogeneous-graph path)."""

    def __init__(self, node_dim_in, edge_dim_in, key, *,
                 param_dtype=jnp.float32, out_dtype=None):
        k_node, k_edge = jax.random.split(key)
        self.node_w, self.node_b = init_linear_params(
            k_node, node_dim_in, HIDDEN, param_dtype)
        self.edge_w, self.edge_b = init_linear_params(
            k_edge, edge_dim_in, HIDDEN, param_dtype)
        self.out_dtype = out_dtype
        self.dim_in = HIDDEN  # matches `self.dim_in = 64` in the module

    def __call__(self, batch):
        x, edge_attr = _feature_encoder_fwd(
            self.node_w, self.node_b, self.edge_w, self.edge_b,
            batch["x"], batch["edge_attr"], out_dtype=self.out_dtype)
        out = dict(batch)
        out["x"] = x
        out["edge_attr"] = edge_attr
        return out


if __name__ == "__main__":
    key = jax.random.PRNGKey(0)
    k_params, k_x, k_e = jax.random.split(key, 3)

    num_nodes, node_dim_in = 200, 16    # small, non-tile-aligned row counts
    num_edges, edge_dim_in = 300, 8

    batch = {
        "x": jax.random.normal(k_x, (num_nodes, node_dim_in), jnp.float32),
        "edge_attr": jax.random.normal(k_e, (num_edges, edge_dim_in), jnp.float32),
        "edge_index": jnp.zeros((2, num_edges), jnp.int32),  # passed through untouched
    }

    enc = FeatureEncoderPallas(node_dim_in, edge_dim_in, k_params)
    out = enc(batch)
    jax.block_until_ready(out["x"])
    jax.block_until_ready(out["edge_attr"])

    # Correctness vs a plain-JAX f32 reference (same math as nn.Linear).
    def ref_linear(x, w, b):
        y = jnp.dot(x.astype(w.dtype), w, preferred_element_type=jnp.float32)
        return y + b

    ref_x = ref_linear(batch["x"], enc.node_w, enc.node_b)
    ref_e = ref_linear(batch["edge_attr"], enc.edge_w, enc.edge_b)
    assert out["x"].shape == (num_nodes, HIDDEN)
    assert out["edge_attr"].shape == (num_edges, HIDDEN)
    assert out["x"].dtype == batch["x"].dtype
    assert out["edge_attr"].dtype == batch["edge_attr"].dtype
    assert jnp.allclose(out["x"], ref_x, atol=1e-4, rtol=1e-4)
    assert jnp.allclose(out["edge_attr"], ref_e, atol=1e-4, rtol=1e-4)

    print("KERNEL_OK")
</pallas_src>

<mosaic_0001>
module attributes {stable_mosaic.version = 11 : i64} {
  func.func @_linear_kernel(%arg0: i32, %arg1: memref<20x120xf32, #tpu.memory_space<vmem>>, %arg2: memref<120x960xf32, #tpu.memory_space<vmem>>, %arg3: memref<1x960xf32, #tpu.memory_space<vmem>>, %arg4: memref<20x960xf32, #tpu.memory_space<vmem>>) attributes {dimension_semantics = [#tpu.dimension_semantics<parallel>], iteration_bounds = array<i64: 1>, scalar_prefetch = 0 : i64, scratch_operands = 0 : i64, tpu.core_type = #tpu.core_type<tc>, window_params = [{transform_indices = @transform_0, window_bounds = array<i64: 20, 120>}, {pipeline_mode = #tpu.pipeline_mode<synchronous>, transform_indices = @transform_1, window_bounds = array<i64: 120, 960>}, {pipeline_mode = #tpu.pipeline_mode<synchronous>, transform_indices = @transform_2, window_bounds = array<i64: 1, 960>}, {transform_indices = @transform_3, window_bounds = array<i64: 20, 960>}]} {
    %c0 = arith.constant 0 : index
    %c0_0 = arith.constant 0 : index
    %0 = vector.load %arg1[%c0, %c0_0] : memref<20x120xf32, #tpu.memory_space<vmem>>, vector<20x120xf32>
    %c0_1 = arith.constant 0 : index
    %c0_2 = arith.constant 0 : index
    %1 = vector.load %arg2[%c0_1, %c0_2] : memref<120x960xf32, #tpu.memory_space<vmem>>, vector<120x960xf32>
    %cst = arith.constant dense<0.000000e+00> : vector<20x960xf32>
    %2 = tpu.matmul %0, %1, %cst {dimension_numbers = #tpu.dot_dimension_numbers<[1], [0], [0], [1], [0, 0, 1, 1], [], []>} : vector<20x120xf32>, vector<120x960xf32>, vector<20x960xf32> -> vector<20x960xf32>
    %c0_3 = arith.constant 0 : index
    %c0_4 = arith.constant 0 : index
    %3 = vector.load %arg3[%c0_3, %c0_4] : memref<1x960xf32, #tpu.memory_space<vmem>>, vector<1x960xf32>
    %4 = vector.broadcast %3 : vector<1x960xf32> to vector<20x960xf32>
    %5 = arith.addf %2, %4 : vector<20x960xf32>
    %c0_5 = arith.constant 0 : index
    %c0_6 = arith.constant 0 : index
    %6 = vector.load %arg4[%c0_5, %c0_6] : memref<20x960xf32, #tpu.memory_space<vmem>>, vector<20x960xf32>
    tpu.vector_store %arg4[%c0_5, %c0_6], %5 {strides = array<i32>} : memref<20x960xf32, #tpu.memory_space<vmem>>, vector<20x960xf32>,
    return
  }
  func.func @transform_0(%arg0: i32) -> (i32, i32) {
    %c0_i32 = arith.constant 0 : i32
    %c0_i32_0 = arith.constant 0 : i32
    return %arg0, %c0_i32 : i32, i32
  }
  func.func @transform_1(%arg0: i32) -> (i32, i32) {
    %c0_i32 = arith.constant 0 : i32
    %c0_i32_0 = arith.constant 0 : i32
    %c0_i32_1 = arith.constant 0 : i32
    return %c0_i32, %c0_i32_0 : i32, i32
  }
  func.func @transform_2(%arg0: i32) -> (i32, i32) {
    %c0_i32 = arith.constant 0 : i32
    %c0_i32_0 = arith.constant 0 : i32
    %c0_i32_1 = arith.constant 0 : i32
    return %c0_i32, %c0_i32_0 : i32, i32
  }
  func.func @transform_3(%arg0: i32) -> (i32, i32) {
    %c0_i32 = arith.constant 0 : i32
    %c0_i32_0 = arith.constant 0 : i32
    return %arg0, %c0_i32 : i32, i32
  }
}

module attributes {stable_mosaic.version = 11 : i64} {
  func.func @_linear_kernel(%arg0: i32, %arg1: memref<25x128xf32, #tpu.memory_space<vmem>>, %arg2: memref<128x512xf32, #tpu.memory_space<vmem>>, %arg3: memref<1x512xf32, #tpu.memory_space<vmem>>, %arg4: memref<25x512xf32, #tpu.memory_space<vmem>>) attributes {dimension_semantics = [#tpu.dimension_semantics<parallel>], iteration_bounds = array<i64: 1>, scalar_prefetch = 0 : i64, scratch_operands = 0 : i64, tpu.core_type = #tpu.core_type<tc>, window_params = [{transform_indices = @transform_0, window_bounds = array<i64: 25, 128>}, {pipeline_mode = #tpu.pipeline_mode<synchronous>, transform_indices = @transform_1, window_bounds = array<i64: 128, 512>}, {pipeline_mode = #tpu.pipeline_mode<synchronous>, transform_indices = @transform_2, window_bounds = array<i64: 1, 512>}, {transform_indices = @transform_3, window_bounds = array<i64: 25, 512>}]} {
    %c0 = arith.constant 0 : index
    %c0_0 = arith.constant 0 : index
    %0 = vector.load %arg1[%c0, %c0_0] : memref<25x128xf32, #tpu.memory_space<vmem>>, vector<25x128xf32>
    %c0_1 = arith.constant 0 : index
    %c0_2 = arith.constant 0 : index
    %1 = vector.load %arg2[%c0_1, %c0_2] : memref<128x512xf32, #tpu.memory_space<vmem>>, vector<128x512xf32>
    %cst = arith.constant dense<0.000000e+00> : vector<25x512xf32>
    %2 = tpu.matmul %0, %1, %cst {dimension_numbers = #tpu.dot_dimension_numbers<[1], [0], [0], [1], [0, 0, 1, 1], [], []>} : vector<25x128xf32>, vector<128x512xf32>, vector<25x512xf32> -> vector<25x512xf32>
    %c0_3 = arith.constant 0 : index
    %c0_4 = arith.constant 0 : index
    %3 = vector.load %arg3[%c0_3, %c0_4] : memref<1x512xf32, #tpu.memory_space<vmem>>, vector<1x512xf32>
    %4 = vector.broadcast %3 : vector<1x512xf32> to vector<25x512xf32>
    %5 = arith.addf %2, %4 : vector<25x512xf32>
    %c0_5 = arith.constant 0 : index
    %c0_6 = arith.constant 0 : index
    %6 = vector.load %arg4[%c0_5, %c0_6] : memref<25x512xf32, #tpu.memory_space<vmem>>, vector<25x512xf32>
    tpu.vector_store %arg4[%c0_5, %c0_6], %5 {strides = array<i32>} : memref<25x512xf32, #tpu.memory_space<vmem>>, vector<25x512xf32>,
    return
  }
  func.func @transform_0(%arg0: i32) -> (i32, i32) {
    %c0_i32 = arith.constant 0 : i32
    %c0_i32_0 = arith.constant 0 : i32
    return %arg0, %c0_i32 : i32, i32
  }
  func.func @transform_1(%arg0: i32) -> (i32, i32) {
    %c0_i32 = arith.constant 0 : i32
    %c0_i32_0 = arith.constant 0 : i32
    %c0_i32_1 = arith.constant 0 : i32
    return %c0_i32, %c0_i32_0 : i32, i32
  }
  func.func @transform_2(%arg0: i32) -> (i32, i32) {
    %c0_i32 = arith.constant 0 : i32
    %c0_i32_0 = arith.constant 0 : i32
    %c0_i32_1 = arith.constant 0 : i32
    return %c0_i32, %c0_i32_0 : i32, i32
  }
  func.func @transform_3(%arg0: i32) -> (i32, i32) {
    %c0_i32 = arith.constant 0 : i32
    %c0_i32_0 = arith.constant 0 : i32
    return %arg0, %c0_i32 : i32, i32
  }
}

</mosaic_0001>

<bundles_post_ra>
// kernel: _feature_encoder_fwd.3
= control target key start
LH: loop header
LB: loop body
LE: loop exit
PB: predicated region body
PF: predicated region fallthrough
CT: control target
= control target key end

     0   :  { %vm155_vm0 = vcmask 982016   ;;  %vm380_vm1 = vcmask 523264   ;;  %vm397_vm2 = vcmask 519168   ;;  %s945_s1 = inlined_call_operand.vmem [shape: f32[120,960], index: 1, kind: input, shape index: {}]   ;;  %s946_s0 = inlined_call_operand.vmem [shape: f32[20,120], index: 0, kind: input, shape index: {}]   ;;  %s947_s2 = inlined_call_operand.vmem [shape: f32[1,960], index: 2, kind: input, shape index: {}]   ;;  %s948_s3 = inlined_call_operand.vmem [shape: f32[20,960], index: 3, kind: output, shape index: {}]  }
   0x1   :  { %v131_v0 = vld [vmem:[%s945_s1 + $0x390] sm:$0xff]  ;;  %v132_v1 = vld [vmem:[%s945_s1 + $0x398] sm:$0xff]  ;;  %v129_v6 = vld [vmem:[%s945_s1 + $0x380] sm:$0xff] }
   0x2   :  { %v123_v2 = vld [vmem:[%s945_s1 + $0x350] sm:$0xff]  ;;  %218 = vmatpush.msra.mxu2 %v131_v0  ;;  %244 = vmatpush.msra.mxu3 %v132_v1  ;;  %v124_v3 = vld [vmem:[%s945_s1 + $0x358] sm:$0xff]  ;;  %v130_v7 = vld [vmem:[%s945_s1 + $0x388] sm:$0xff] }
   0x3   :  { %v115_v4 = vld [vmem:[%s945_s1 + $0x310] sm:$0xff]  ;;  %v116_v5 = vld [vmem:[%s945_s1 + $0x318] sm:$0xff]  ;;  %v121_v8 = vld [vmem:[%s945_s1 + $0x340] sm:$0xff]  ;;  %166 = vmatpush.msra.mxu0 %v129_v6  ;;  %192 = vmatpush.msra.mxu1 %v130_v7 }
   0x4   :  { %219 = vmatpush.msra.mxu2 %v123_v2  ;;  %245 = vmatpush.msra.mxu3 %v124_v3  ;;  %v122_v9 = vld [vmem:[%s945_s1 + $0x348] sm:$0xff]  ;;  %v107_v10 = vld [vmem:[%s945_s1 + $0x2d0] sm:$0xff]  ;;  %v108_v11 = vld [vmem:[%s945_s1 + $0x2d8] sm:$0xff] }
   0x5   :  { %v113_v12 = vld [vmem:[%s945_s1 + $0x300] sm:$0xff]  ;;  %v114_v13 = vld [vmem:[%s945_s1 + $0x308] sm:$0xff]  ;;  %167 = vmatpush.msra.mxu0 %v121_v8  ;;  %193 = vmatpush.msra.mxu1 %v122_v9  ;;  %v99_v14 = vld [vmem:[%s945_s1 + $0x290] sm:$0xff] }
   0x6   :  { %220 = vmatpush.msra.mxu2 %v115_v4  ;;  %246 = vmatpush.msra.mxu3 %v116_v5  ;;  %v100_v15 = vld [vmem:[%s945_s1 + $0x298] sm:$0xff]  ;;  %v105_v16 = vld [vmem:[%s945_s1 + $0x2c0] sm:$0xff]  ;;  %v106_v17 = vld [vmem:[%s945_s1 + $0x2c8] sm:$0xff] }
   0x7   :  { %168 = vmatpush.msra.mxu0 %v113_v12  ;;  %194 = vmatpush.msra.mxu1 %v114_v13  ;;  %v91_v18 = vld [vmem:[%s945_s1 + $0x250] sm:$0xff]  ;;  %v92_v19 = vld [vmem:[%s945_s1 + $0x258] sm:$0xff]  ;;  %v97_v20 = vld [vmem:[%s945_s1 + $0x280] sm:$0xff] }
   0x8   :  { %221 = vmatpush.msra.mxu2 %v107_v10  ;;  %247 = vmatpush.msra.mxu3 %v108_v11  ;;  %v98_v21 = vld [vmem:[%s945_s1 + $0x288] sm:$0xff]  ;;  %v83_v22 = vld [vmem:[%s945_s1 + $0x210] sm:$0xff]  ;;  %v84_v23 = vld [vmem:[%s945_s1 + $0x218] sm:$0xff] }
   0x9   :  { %169 = vmatpush.msra.mxu0 %v105_v16  ;;  %195 = vmatpush.msra.mxu1 %v106_v17  ;;  %v89_v24 = vld [vmem:[%s945_s1 + $0x240] sm:$0xff]  ;;  %v90_v25 = vld [vmem:[%s945_s1 + $0x248] sm:$0xff]  ;;  %v75_v26 = vld [vmem:[%s945_s1 + $0x1d0] sm:$0xff] }
   0xa   :  { %222 = vmatpush.msra.mxu2 %v99_v14  ;;  %248 = vmatpush.msra.mxu3 %v100_v15  ;;  %v76_v27 = vld [vmem:[%s945_s1 + $0x1d8] sm:$0xff]  ;;  %v81_v28 = vld [vmem:[%s945_s1 + $0x200] sm:$0xff]  ;;  %v82_v29 = vld [vmem:[%s945_s1 + $0x208] sm:$0xff] }
   0xb   :  { %170 = vmatpush.msra.mxu0 %v97_v20  ;;  %196 = vmatpush.msra.mxu1 %v98_v21  ;;  %v67_v30 = vld [vmem:[%s945_s1 + $0x190] sm:$0xff]  ;;  %v68_v31 = vld [vmem:[%s945_s1 + $0x198] sm:$0xff]  ;;  %v73_v32 = vld [vmem:[%s945_s1 + $0x1c0] sm:$0xff] }
   0xc   :  { %223 = vmatpush.msra.mxu2 %v91_v18  ;;  %249 = vmatpush.msra.mxu3 %v92_v19  ;;  %v74_v33 = vld [vmem:[%s945_s1 + $0x1c8] sm:$0xff]  ;;  %v59_v34 = vld [vmem:[%s945_s1 + $0x150] sm:$0xff]  ;;  %v60_v35 = vld [vmem:[%s945_s1 + $0x158] sm:$0xff] }
   0xd   :  { %171 = vmatpush.msra.mxu0 %v89_v24  ;;  %197 = vmatpush.msra.mxu1 %v90_v25  ;;  %v65_v36 = vld [vmem:[%s945_s1 + $0x180] sm:$0xff]  ;;  %v66_v37 = vld [vmem:[%s945_s1 + $0x188] sm:$0xff]  ;;  %v51_v38 = vld [vmem:[%s945_s1 + $0x110] sm:$0xff] }
   0xe   :  { %224 = vmatpush.msra.mxu2 %v83_v22  ;;  %250 = vmatpush.msra.mxu3 %v84_v23  ;;  %v52_v39 = vld [vmem:[%s945_s1 + $0x118] sm:$0xff]  ;;  %v57_v40 = vld [vmem:[%s945_s1 + $0x140] sm:$0xff]  ;;  %v58_v41 = vld [vmem:[%s945_s1 + $0x148] sm:$0xff] }
   0xf   :  { %172 = vmatpush.msra.mxu0 %v81_v28  ;;  %198 = vmatpush.msra.mxu1 %v82_v29  ;;  %v43_v42 = vld [vmem:[%s945_s1 + $0xd0] sm:$0xff]  ;;  %v44_v43 = vld [vmem:[%s945_s1 + $0xd8] sm:$0xff]  ;;  %v49_v44 = vld [vmem:[%s945_s1 + $0x100] sm:$0xff] }
  0x10   :  { %225 = vmatpush.msra.mxu2 %v75_v26  ;;  %251 = vmatpush.msra.mxu3 %v76_v27  ;;  %v50_v45 = vld [vmem:[%s945_s1 + $0x108] sm:$0xff]  ;;  %v35_v46 = vld [vmem:[%s945_s1 + $0x90] sm:$0xff]  ;;  %v36_v47 = vld [vmem:[%s945_s1 + $0x98] sm:$0xff] }
  0x11   :  { %173 = vmatpush.msra.mxu0 %v73_v32  ;;  %199 = vmatpush.msra.mxu1 %v74_v33  ;;  %v41_v48 = vld [vmem:[%s945_s1 + $0xc0] sm:$0xff]  ;;  %v42_v49 = vld [vmem:[%s945_s1 + $0xc8] sm:$0xff]  ;;  %v27_v50 = vld [vmem:[%s945_s1 + $0x50] sm:$0xff] }
  0x12   :  { %226 = vmatpush.msra.mxu2 %v67_v30  ;;  %252 = vmatpush.msra.mxu3 %v68_v31  ;;  %v28_v51 = vld [vmem:[%s945_s1 + $0x58] sm:$0xff]  ;;  %v33_v52 = vld [vmem:[%s945_s1 + $0x80] sm:$0xff]  ;;  %v34_v53 = vld [vmem:[%s945_s1 + $0x88] sm:$0xff] }
  0x13   :  { %174 = vmatpush.msra.mxu0 %v65_v36  ;;  %200 = vmatpush.msra.mxu1 %v66_v37  ;;  %v19_v54 = vld [vmem:[%s945_s1 + $0x10] sm:$0xff]  ;;  %v20_v55 = vld [vmem:[%s945_s1 + $0x18] sm:$0xff]  ;;  %v25_v58 = vld [vmem:[%s945_s1 + $0x40] sm:$0xff] }
  0x14   :  { %227 = vmatpush.msra.mxu2 %v59_v34  ;;  %253 = vmatpush.msra.mxu3 %v60_v35  ;;  %v135_v56 = vld [vmem:[%s945_s1 + $0x3b0] sm:$0xff]  ;;  %v136_v57 = vld [vmem:[%s945_s1 + $0x3b8] sm:$0xff]  ;;  %v26_v59 = vld [vmem:[%s945_s1 + $0x48] sm:$0xff] }
  0x15   :  { %175 = vmatpush.msra.mxu0 %v57_v40  ;;  %201 = vmatpush.msra.mxu1 %v58_v41  ;;  %v127_v60 = vld [vmem:[%s945_s1 + $0x370] sm:$0xff]  ;;  %v128_v61 = vld [vmem:[%s945_s1 + $0x378] sm:$0xff]  ;;  %v17_v62 = vld [vmem:[%s945_s1] sm:$0xff] }
  0x16   :  { %228 = vmatpush.msra.mxu2 %v51_v38  ;;  %254 = vmatpush.msra.mxu3 %v52_v39  ;;  %v18_v63 = vld [vmem:[%s945_s1 + $0x8] sm:$0xff]  ;;  %v119_v0 = vld [vmem:[%s945_s1 + $0x330] sm:$0xff]  ;;  %v120_v1 = vld [vmem:[%s945_s1 + $0x338] sm:$0xff] }
  0x17   :  { %176 = vmatpush.msra.mxu0 %v49_v44  ;;  %202 = vmatpush.msra.mxu1 %v50_v45  ;;  %v648_v2 = vld [vmem:[%s946_s0] sm:$0xff]  ;;  %v134_v4 = vld [vmem:[%s945_s1 + $0x3a8] sm:$0xff]  ;;  %v111_v5 = vld [vmem:[%s945_s1 + $0x2f0] sm:$0xff] }
  0x18   :  { %229 = vmatpush.msra.mxu2 %v43_v42  ;;  %255 = vmatpush.msra.mxu3 %v44_v43  ;;  %v133_v3 = vld [vmem:[%s945_s1 + $0x3a0] sm:$0xff]  ;;  %v112_v6 = vld [vmem:[%s945_s1 + $0x2f8] sm:$0xff]  ;;  %v126_v8 = vld [vmem:[%s945_s1 + $0x368] sm:$0xff] }
  0x19   :  { %177 = vmatpush.msra.mxu0 %v41_v48  ;;  %203 = vmatpush.msra.mxu1 %v42_v49  ;;  %v125_v7 = vld [vmem:[%s945_s1 + $0x360] sm:$0xff]  ;;  %v103_v9 = vld [vmem:[%s945_s1 + $0x2b0] sm:$0xff]  ;;  %v104_v10 = vld [vmem:[%s945_s1 + $0x2b8] sm:$0xff] }
  0x1a   :  { %230 = vmatpush.msra.mxu2 %v35_v46  ;;  %256 = vmatpush.msra.mxu3 %v36_v47  ;;  %v117_v11 = vld [vmem:[%s945_s1 + $0x320] sm:$0xff]  ;;  %v118_v12 = vld [vmem:[%s945_s1 + $0x328] sm:$0xff]  ;;  %v95_v13 = vld [vmem:[%s945_s1 + $0x270] sm:$0xff] }
  0x1b   :  { %178 = vmatpush.msra.mxu0 %v33_v52  ;;  %204 = vmatpush.msra.mxu1 %v34_v53  ;;  %v96_v14 = vld [vmem:[%s945_s1 + $0x278] sm:$0xff]  ;;  %v109_v15 = vld [vmem:[%s945_s1 + $0x2e0] sm:$0xff]  ;;  %v110_v16 = vld [vmem:[%s945_s1 + $0x2e8] sm:$0xff] }
  0x1c   :  { %231 = vmatpush.msra.mxu2 %v27_v50  ;;  %257 = vmatpush.msra.mxu3 %v28_v51  ;;  %v87_v17 = vld [vmem:[%s945_s1 + $0x230] sm:$0xff]  ;;  %v88_v18 = vld [vmem:[%s945_s1 + $0x238] sm:$0xff]  ;;  %v709_v19 = vld [vmem:[%s946_s0 + $0x8] sm:$0xff] }
  0x1d   :  { %179 = vmatpush.msra.mxu0 %v25_v58  ;;  %205 = vmatpush.msra.mxu1 %v26_v59  ;;  %v101_v20 = vld [vmem:[%s945_s1 + $0x2a0] sm:$0xff]  ;;  %v102_v21 = vld [vmem:[%s945_s1 + $0x2a8] sm:$0xff]  ;;  %v79_v22 = vld [vmem:[%s945_s1 + $0x1f0] sm:$0xff] }
  0x1e   :  { %232 = vmatpush.msra.mxu2 %v19_v54  ;;  %258 = vmatpush.msra.mxu3 %v20_v55  ;;  %v80_v23 = vld [vmem:[%s945_s1 + $0x1f8] sm:$0xff]  ;;  %v93_v24 = vld [vmem:[%s945_s1 + $0x260] sm:$0xff]  ;;  %v94_v25 = vld [vmem:[%s945_s1 + $0x268] sm:$0xff] }
  0x1f   :  { %180 = vmatpush.msra.mxu0 %v17_v62  ;;  %206 = vmatpush.msra.mxu1 %v18_v63  ;;  %v71_v26 = vld [vmem:[%s945_s1 + $0x1b0] sm:$0xff]  ;;  %v72_v27 = vld [vmem:[%s945_s1 + $0x1b8] sm:$0xff]  ;;  %v85_v28 = vld [vmem:[%s945_s1 + $0x220] sm:$0xff] }
  0x20   :  { %322 = vmatpush.msrb.mxu2 %v135_v56  ;;  %348 = vmatpush.msrb.mxu3 %v136_v57  ;;  %v86_v29 = vld [vmem:[%s945_s1 + $0x228] sm:$0xff]  ;;  %v63_v30 = vld [vmem:[%s945_s1 + $0x170] sm:$0xff]  ;;  %v64_v31 = vld [vmem:[%s945_s1 + $0x178] sm:$0xff] }
  0x21   :  { %409 = vmatmul.msk.f32.vlgmr.msra.gmra.mxu2 %vm155_vm0, %v648_v2  ;;  %412 = vmatmul.msk.f32.vlgmr.msra.gmra.mxu3 %vm155_vm0, %v648_v2  ;;  %v77_v32 = vld [vmem:[%s945_s1 + $0x1e0] sm:$0xff]  ;;  %v78_v33 = vld [vmem:[%s945_s1 + $0x1e8] sm:$0xff]  ;;  %v55_v34 = vld [vmem:[%s945_s1 + $0x130] sm:$0xff] }
  0x22   :  { %323 = vmatpush.msrb.mxu2 %v127_v60  ;;  %349 = vmatpush.msrb.mxu3 %v128_v61  ;;  %v56_v35 = vld [vmem:[%s945_s1 + $0x138] sm:$0xff]  ;;  %v770_v36 = vld [vmem:[%s946_s0 + $0x10] sm:$0xf]  ;;  %v69_v37 = vld [vmem:[%s945_s1 + $0x1a0] sm:$0xff] }
  0x23   :  { %270 = vmatpush.msrb.mxu0 %v133_v3  ;;  %296 = vmatpush.msrb.mxu1 %v134_v4  ;;  %v70_v38 = vld [vmem:[%s945_s1 + $0x1a8] sm:$0xff]  ;;  %v47_v39 = vld [vmem:[%s945_s1 + $0xf0] sm:$0xff]  ;;  %v48_v40 = vld [vmem:[%s945_s1 + $0xf8] sm:$0xff] }
  0x24   :  { %324 = vmatpush.msrb.mxu2 %v119_v0  ;;  %350 = vmatpush.msrb.mxu3 %v120_v1  ;;  %v61_v41 = vld [vmem:[%s945_s1 + $0x160] sm:$0xff]  ;;  %v62_v42 = vld [vmem:[%s945_s1 + $0x168] sm:$0xff]  ;;  %v39_v43 = vld [vmem:[%s945_s1 + $0xb0] sm:$0xff] }
  0x25   :  { %271 = vmatpush.msrb.mxu0 %v125_v7  ;;  %297 = vmatpush.msrb.mxu1 %v126_v8  ;;  %v40_v44 = vld [vmem:[%s945_s1 + $0xb8] sm:$0xff]  ;;  %v53_v45 = vld [vmem:[%s945_s1 + $0x120] sm:$0xff]  ;;  %v54_v46 = vld [vmem:[%s945_s1 + $0x128] sm:$0xff] }
  0x26   :  { %325 = vmatpush.msrb.mxu2 %v111_v5  ;;  %351 = vmatpush.msrb.mxu3 %v112_v6  ;;  %v31_v47 = vld [vmem:[%s945_s1 + $0x70] sm:$0xff]  ;;  %v32_v48 = vld [vmem:[%s945_s1 + $0x78] sm:$0xff]  ;;  %v45_v49 = vld [vmem:[%s945_s1 + $0xe0] sm:$0xff] }
  0x27   :  { %272 = vmatpush.msrb.mxu0 %v117_v11  ;;  %298 = vmatpush.msrb.mxu1 %v118_v12  ;;  %v46_v50 = vld [vmem:[%s945_s1 + $0xe8] sm:$0xff]  ;;  %v23_v51 = vld [vmem:[%s945_s1 + $0x30] sm:$0xff]  ;;  %v24_v52 = vld [vmem:[%s945_s1 + $0x38] sm:$0xff] }
  0x28   :  { %326 = vmatpush.msrb.mxu2 %v103_v9  ;;  %352 = vmatpush.msrb.mxu3 %v104_v10  ;;  %v37_v53 = vld [vmem:[%s945_s1 + $0xa0] sm:$0xff]  ;;  %v38_v54 = vld [vmem:[%s945_s1 + $0xa8] sm:$0xff] }
  0x29   :  { %403 = vmatmul.msk.f32.vlgmr.msra.gmra.mxu0 %vm155_vm0, %v648_v2  ;;  %406 = vmatmul.msk.f32.vlgmr.msra.gmra.mxu1 %vm155_vm0, %v648_v2  ;;  %v29_v55 = vld [vmem:[%s945_s1 + $0x60] sm:$0xff]  ;;  %v30_v56 = vld [vmem:[%s945_s1 + $0x68] sm:$0xff] }
  0x2a   :  { %327 = vmatpush.msrb.mxu2 %v95_v13  ;;  %353 = vmatpush.msrb.mxu3 %v96_v14  ;;  %v21_v57 = vld [vmem:[%s945_s1 + $0x20] sm:$0xff]  ;;  %v22_v58 = vld [vmem:[%s945_s1 + $0x28] sm:$0xff] }
  0x2b   :  { %273 = vmatpush.msrb.mxu0 %v109_v15  ;;  %299 = vmatpush.msrb.mxu1 %v110_v16  ;;  %v137_v59 = vld [vmem:[%s947_s2] sm:$0xff] }
  0x2c   :  { %328 = vmatpush.msrb.mxu2 %v87_v17  ;;  %354 = vmatpush.msrb.mxu3 %v88_v18  ;;  %v141_v60 = vperm.slane %v137_v59, 2  ;;  %v139_v61 = vperm.slane %v137_v59, 0  ;;  %v140_v62 = vperm.slane %v137_v59, 1  ;;  %v142_v63 = vperm.slane %v137_v59, 3 }
  0x2d   :  { %410 = vmatmul.msk.f32.gmra.mxu2 %vm155_vm0, %v709_v19  ;;  %413 = vmatmul.msk.f32.gmra.mxu3 %vm155_vm0, %v709_v19 }
  0x2e   :  { %274 = vmatpush.msrb.mxu0 %v101_v20  ;;  %300 = vmatpush.msrb.mxu1 %v102_v21 }
  0x2f   :  { %329 = vmatpush.msrb.mxu2 %v79_v22  ;;  %355 = vmatpush.msrb.mxu3 %v80_v23 }
  0x30   :  { %275 = vmatpush.msrb.mxu0 %v93_v24  ;;  %301 = vmatpush.msrb.mxu1 %v94_v25  ;;  %v143_v24 = vperm.slane %v137_v59, 4  ;;  %v144_v25 = vperm.slane %v137_v59, 5 }
  0x31   :  { %330 = vmatpush.msrb.mxu2 %v71_v26  ;;  %356 = vmatpush.msrb.mxu3 %v72_v27  ;;  %v145_v26 = vperm.slane %v137_v59, 6  ;;  %v146_v27 = vperm.slane %v137_v59, 7 }
  0x32   :  { %276 = vmatpush.msrb.mxu0 %v85_v28  ;;  %302 = vmatpush.msrb.mxu1 %v86_v29 }
  0x33   :  { %331 = vmatpush.msrb.mxu2 %v63_v30  ;;  %357 = vmatpush.msrb.mxu3 %v64_v31 }
  0x34   :  { %404 = vmatmul.msk.f32.gmra.mxu0 %vm155_vm0, %v709_v19  ;;  %407 = vmatmul.msk.f32.gmra.mxu1 %vm155_vm0, %v709_v19 }
  0x35   :  { %277 = vmatpush.msrb.mxu0 %v77_v32  ;;  %303 = vmatpush.msrb.mxu1 %v78_v33 }
  0x36   :  { %332 = vmatpush.msrb.mxu2 %v55_v34  ;;  %358 = vmatpush.msrb.mxu3 %v56_v35 }
  0x37   :  { %411 = vmatmul.msk.f32.gmra.mxu2 %vm155_vm0, %v770_v36  ;;  %414 = vmatmul.msk.f32.gmra.mxu3 %vm155_vm0, %v770_v36 }
  0x38   :  { %278 = vmatpush.msrb.mxu0 %v69_v37  ;;  %304 = vmatpush.msrb.mxu1 %v70_v38 }
  0x39   :  { %333 = vmatpush.msrb.mxu2 %v47_v39  ;;  %359 = vmatpush.msrb.mxu3 %v48_v40 }
  0x3a   :  { %279 = vmatpush.msrb.mxu0 %v61_v41  ;;  %305 = vmatpush.msrb.mxu1 %v62_v42 }
  0x3b   :  { %334 = vmatpush.msrb.mxu2 %v39_v43  ;;  %360 = vmatpush.msrb.mxu3 %v40_v44 }
  0x3c   :  { %280 = vmatpush.msrb.mxu0 %v53_v45  ;;  %306 = vmatpush.msrb.mxu1 %v54_v46 }
  0x3d   :  { %335 = vmatpush.msrb.mxu2 %v31_v47  ;;  %361 = vmatpush.msrb.mxu3 %v32_v48 }
  0x3e   :  { %405 = vmatmul.msk.f32.gmra.mxu0 %vm155_vm0, %v770_v36  ;;  %408 = vmatmul.msk.f32.gmra.mxu1 %vm155_vm0, %v770_v36 }
  0x3f   :  { %281 = vmatpush.msrb.mxu0 %v45_v49  ;;  %307 = vmatpush.msrb.mxu1 %v46_v50 }
  0x40   :  { %336 = vmatpush.msrb.mxu2 %v23_v51  ;;  %362 = vmatpush.msrb.mxu3 %v24_v52 }
  0x41   :  { %421 = vmatmul.msk.f32.vlgmr.msrb.gmra.mxu2 %vm155_vm0, %v648_v2  ;;  %424 = vmatmul.msk.f32.vlgmr.msrb.gmra.mxu3 %vm155_vm0, %v648_v2 }
  0x42   :  { %282 = vmatpush.msrb.mxu0 %v37_v53  ;;  %308 = vmatpush.msrb.mxu1 %v38_v54 }
  0x44   :  { %283 = vmatpush.msrb.mxu0 %v29_v55  ;;  %309 = vmatpush.msrb.mxu1 %v30_v56 }
  0x46   :  { %284 = vmatpush.msrb.mxu0 %v21_v57  ;;  %310 = vmatpush.msrb.mxu1 %v22_v58 }
  0x47   :  { %415 = vmatmul.msk.f32.vlgmr.msrb.gmra.mxu0 %vm155_vm0, %v648_v2  ;;  %418 = vmatmul.msk.f32.vlgmr.msrb.gmra.mxu1 %vm155_vm0, %v648_v2 }
  0x49   :  { %422 = vmatmul.msk.f32.gmra.mxu2 %vm155_vm0, %v709_v19  ;;  %425 = vmatmul.msk.f32.gmra.mxu3 %vm155_vm0, %v709_v19 }
  0x4f   :  { %416 = vmatmul.msk.f32.gmra.mxu0 %vm155_vm0, %v709_v19  ;;  %419 = vmatmul.msk.f32.gmra.mxu1 %vm155_vm0, %v709_v19 }
  0x51   :  { %423 = vmatmul.msk.f32.gmra.mxu2 %vm155_vm0, %v770_v36  ;;  %426 = vmatmul.msk.f32.gmra.mxu3 %vm155_vm0, %v770_v36 }
  0x57   :  { %417 = vmatmul.msk.f32.gmra.mxu0 %vm155_vm0, %v770_v36  ;;  %420 = vmatmul.msk.f32.gmra.mxu1 %vm155_vm0, %v770_v36 }
  0xa4   :  { %v234_v0 = vpop.f32.mrf.mxu2  ;;  %v260_v1 = vpop.f32.mrf.mxu3 }
  0xa5   :  { %v235_v4 = vadd.f32 %v234_v0, %v141_v60  ;;  %v261_v7 = vadd.f32 %v260_v1, %v142_v63 }
  0xa6   :  { %v182_v2 = vpop.f32.mrf.mxu0  ;;  %v208_v3 = vpop.f32.mrf.mxu1 }
  0xa7   :  { %v183_v5 = vadd.f32 %v182_v2, %v139_v61  ;;  %v209_v6 = vadd.f32 %v208_v3, %v140_v62  ;;  %375 = vst [vmem:[%s948_s3 + $0x10] sm:$0xff] %v235_v4 }
  0xa8   :  { %376 = vst [vmem:[%s948_s3 + $0x18] sm:$0xff] %v261_v7 }
  0xa9   :  { %373 = vst [vmem:[%s948_s3] sm:$0xff] %v183_v5 }
  0xaa   :  { %374 = vst [vmem:[%s948_s3 + $0x8] sm:$0xff] %v209_v6 }
  0xb0   :  { %v237_v8 = vpop.f32.mrf.mxu2  ;;  %v263_v9 = vpop.f32.mrf.mxu3 }
  0xb1   :  { %v185_v10 = vpop.f32.mrf.mxu0  ;;  %v211_v11 = vpop.f32.mrf.mxu1  ;;  %v238_v12 = vadd.f32 %v237_v8, %v141_v60  ;;  %v264_v15 = vadd.f32 %v263_v9, %v142_v63 }
  0xb2   :  { %v186_v13 = vadd.f32 %v185_v10, %v139_v61  ;;  %v212_v14 = vadd.f32 %v211_v11, %v140_v62 }
  0xb3   :  { %384 = vst [vmem:[%s948_s3 + $0x50] sm:$0xff] %v238_v12 }
  0xb4   :  { %382 = vst [vmem:[%s948_s3 + $0x40] sm:$0xff] %v186_v13 }
  0xb5   :  { %383 = vst [vmem:[%s948_s3 + $0x48] sm:$0xff] %v212_v14 }
  0xb6   :  { %385 = vst [vmem:[%s948_s3 + $0x58] sm:$0xff] %v264_v15 }
  0xba   :  { %v240_v16 = vpop.f32.mrf.mxu2  ;;  %v266_v17 = vpop.f32.mrf.mxu3 }
  0xbb   :  { %v188_v18 = vpop.f32.mrf.mxu0  ;;  %v214_v19 = vpop.f32.mrf.mxu1  ;;  %v241_v20 = vadd.f32 %v240_v16, %v141_v60  ;;  %v267_v23 = vadd.f32 %v266_v17, %v142_v63 }
  0xbc   :  { %v189_v21 = vadd.f32 %v188_v18, %v139_v61  ;;  %v215_v22 = vadd.f32 %v214_v19, %v140_v62 }
  0xbd   :  { %392 = vst [vmem:[%s948_s3 + $0x90] sm:$0xf] %v241_v20 }
  0xbe   :  { %390 = vst [vmem:[%s948_s3 + $0x80] sm:$0xf] %v189_v21 }
  0xbf   :  { %391 = vst [vmem:[%s948_s3 + $0x88] sm:$0xf] %v215_v22 }
  0xc0   :  { %393 = vst [vmem:[%s948_s3 + $0x98] sm:$0xf] %v267_v23 }
  0xc4   :  { %v286_v28 = vpop.f32.mrf.mxu0  ;;  %v312_v29 = vpop.f32.mrf.mxu1 }
  0xc5   :  { %v287_v30 = vadd.f32 %v286_v28, %v143_v24  ;;  %v313_v31 = vadd.f32 %v312_v29, %v144_v25  ;;  %v338_v32 = vpop.f32.mrf.mxu2  ;;  %v364_v33 = vpop.f32.mrf.mxu3 }
  0xc6   :  { %v339_v34 = vadd.f32 %v338_v32, %v145_v26  ;;  %v365_v35 = vadd.f32 %v364_v33, %v146_v27 }
  0xc7   :  { %377 = vst [vmem:[%s948_s3 + $0x20] sm:$0xff] %v287_v30 }
  0xc8   :  { %378 = vst [vmem:[%s948_s3 + $0x28] sm:$0xff] %v313_v31 }
  0xc9   :  { %379 = vst [vmem:[%s948_s3 + $0x30] sm:$0xff] %v339_v34 }
  0xca   :  { %381 = vst.msk [vmem:[%s948_s3 + $0x38] sm:$0xff] %vm380_vm1, %v365_v35 }
  0xcc   :  { %v289_v36 = vpop.f32.mrf.mxu0  ;;  %v315_v37 = vpop.f32.mrf.mxu1 }
  0xcd   :  { %v290_v38 = vadd.f32 %v289_v36, %v143_v24  ;;  %v316_v39 = vadd.f32 %v315_v37, %v144_v25  ;;  %v341_v40 = vpop.f32.mrf.mxu2  ;;  %v367_v41 = vpop.f32.mrf.mxu3 }
  0xce   :  { %v342_v42 = vadd.f32 %v341_v40, %v145_v26  ;;  %v368_v43 = vadd.f32 %v367_v41, %v146_v27 }
  0xcf   :  { %386 = vst [vmem:[%s948_s3 + $0x60] sm:$0xff] %v290_v38 }
  0xd0   :  { %387 = vst [vmem:[%s948_s3 + $0x68] sm:$0xff] %v316_v39 }
  0xd1   :  { %388 = vst [vmem:[%s948_s3 + $0x70] sm:$0xff] %v342_v42 }
  0xd2   :  { %389 = vst.msk [vmem:[%s948_s3 + $0x78] sm:$0xff] %vm380_vm1, %v368_v43 }
  0xd4   :  { %v292_v44 = vpop.f32.mrf.mxu0  ;;  %v318_v45 = vpop.f32.mrf.mxu1 }
  0xd5   :  { %v293_v46 = vadd.f32 %v292_v44, %v143_v24  ;;  %v319_v47 = vadd.f32 %v318_v45, %v144_v25  ;;  %v344_v48 = vpop.f32.mrf.mxu2  ;;  %v370_v49 = vpop.f32.mrf.mxu3 }
  0xd6   :  { %v345_v50 = vadd.f32 %v344_v48, %v145_v26  ;;  %v371_v51 = vadd.f32 %v370_v49, %v146_v27 }
  0xd7   :  { %394 = vst [vmem:[%s948_s3 + $0xa0] sm:$0xf] %v293_v46 }
  0xd8   :  { %395 = vst [vmem:[%s948_s3 + $0xa8] sm:$0xf] %v319_v47 }
  0xd9   :  { %396 = vst [vmem:[%s948_s3 + $0xb0] sm:$0xf] %v345_v50 }
  0xda   :  { %398 = vst.msk [vmem:[%s948_s3 + $0xb8] sm:$0xf] %vm397_vm2, %v371_v51 }

// kernel: _feature_encoder_fwd.2
= control target key start
LH: loop header
LB: loop body
LE: loop exit
PB: predicated region body
PF: predicated region fallthrough
CT: control target
= control target key end

     0   :  { %s503_s1 = inlined_call_operand.vmem [shape: f32[128,512], index: 1, kind: input, shape index: {}]   ;;  %s504_s0 = inlined_call_operand.vmem [shape: f32[25,128], index: 0, kind: input, shape index: {}]   ;;  %s505_s2 = inlined_call_operand.vmem [shape: f32[1,512], index: 2, kind: input, shape index: {}]   ;;  %s506_s3 = inlined_call_operand.vmem [shape: f32[25,512], index: 3, kind: output, shape index: {}]  }
   0x1   :  { %v80_v0 = vld [vmem:[%s503_s1 + $0x1f0] sm:$0xff]  ;;  %v81_v1 = vld [vmem:[%s503_s1 + $0x1f8] sm:$0xff]  ;;  %v78_v6 = vld [vmem:[%s503_s1 + $0x1e0] sm:$0xff] }
   0x2   :  { %v76_v2 = vld [vmem:[%s503_s1 + $0x1d0] sm:$0xff]  ;;  %150 = vmatpush.msra.mxu2 %v80_v0  ;;  %179 = vmatpush.msra.mxu3 %v81_v1  ;;  %v77_v3 = vld [vmem:[%s503_s1 + $0x1d8] sm:$0xff]  ;;  %v79_v7 = vld [vmem:[%s503_s1 + $0x1e8] sm:$0xff] }
   0x3   :  { %v72_v4 = vld [vmem:[%s503_s1 + $0x1b0] sm:$0xff]  ;;  %v73_v5 = vld [vmem:[%s503_s1 + $0x1b8] sm:$0xff]  ;;  %v74_v8 = vld [vmem:[%s503_s1 + $0x1c0] sm:$0xff]  ;;  %92 = vmatpush.msra.mxu0 %v78_v6  ;;  %121 = vmatpush.msra.mxu1 %v79_v7 }
   0x4   :  { %151 = vmatpush.msra.mxu2 %v76_v2  ;;  %180 = vmatpush.msra.mxu3 %v77_v3  ;;  %v75_v9 = vld [vmem:[%s503_s1 + $0x1c8] sm:$0xff]  ;;  %v68_v10 = vld [vmem:[%s503_s1 + $0x190] sm:$0xff]  ;;  %v69_v11 = vld [vmem:[%s503_s1 + $0x198] sm:$0xff] }
   0x5   :  { %v70_v12 = vld [vmem:[%s503_s1 + $0x1a0] sm:$0xff]  ;;  %v71_v13 = vld [vmem:[%s503_s1 + $0x1a8] sm:$0xff]  ;;  %93 = vmatpush.msra.mxu0 %v74_v8  ;;  %122 = vmatpush.msra.mxu1 %v75_v9  ;;  %v64_v14 = vld [vmem:[%s503_s1 + $0x170] sm:$0xff] }
   0x6   :  { %152 = vmatpush.msra.mxu2 %v72_v4  ;;  %181 = vmatpush.msra.mxu3 %v73_v5  ;;  %v65_v15 = vld [vmem:[%s503_s1 + $0x178] sm:$0xff]  ;;  %v66_v16 = vld [vmem:[%s503_s1 + $0x180] sm:$0xff]  ;;  %v67_v17 = vld [vmem:[%s503_s1 + $0x188] sm:$0xff] }
   0x7   :  { %94 = vmatpush.msra.mxu0 %v70_v12  ;;  %123 = vmatpush.msra.mxu1 %v71_v13  ;;  %v60_v18 = vld [vmem:[%s503_s1 + $0x150] sm:$0xff]  ;;  %v61_v19 = vld [vmem:[%s503_s1 + $0x158] sm:$0xff]  ;;  %v62_v20 = vld [vmem:[%s503_s1 + $0x160] sm:$0xff] }
   0x8   :  { %153 = vmatpush.msra.mxu2 %v68_v10  ;;  %182 = vmatpush.msra.mxu3 %v69_v11  ;;  %v63_v21 = vld [vmem:[%s503_s1 + $0x168] sm:$0xff]  ;;  %v56_v22 = vld [vmem:[%s503_s1 + $0x130] sm:$0xff]  ;;  %v57_v23 = vld [vmem:[%s503_s1 + $0x138] sm:$0xff] }
   0x9   :  { %95 = vmatpush.msra.mxu0 %v66_v16  ;;  %124 = vmatpush.msra.mxu1 %v67_v17  ;;  %v58_v24 = vld [vmem:[%s503_s1 + $0x140] sm:$0xff]  ;;  %v59_v25 = vld [vmem:[%s503_s1 + $0x148] sm:$0xff]  ;;  %v52_v26 = vld [vmem:[%s503_s1 + $0x110] sm:$0xff] }
   0xa   :  { %154 = vmatpush.msra.mxu2 %v64_v14  ;;  %183 = vmatpush.msra.mxu3 %v65_v15  ;;  %v53_v27 = vld [vmem:[%s503_s1 + $0x118] sm:$0xff]  ;;  %v54_v28 = vld [vmem:[%s503_s1 + $0x120] sm:$0xff]  ;;  %v55_v29 = vld [vmem:[%s503_s1 + $0x128] sm:$0xff] }
   0xb   :  { %96 = vmatpush.msra.mxu0 %v62_v20  ;;  %125 = vmatpush.msra.mxu1 %v63_v21  ;;  %v48_v30 = vld [vmem:[%s503_s1 + $0xf0] sm:$0xff]  ;;  %v49_v31 = vld [vmem:[%s503_s1 + $0xf8] sm:$0xff]  ;;  %v50_v32 = vld [vmem:[%s503_s1 + $0x100] sm:$0xff] }
   0xc   :  { %155 = vmatpush.msra.mxu2 %v60_v18  ;;  %184 = vmatpush.msra.mxu3 %v61_v19  ;;  %v51_v33 = vld [vmem:[%s503_s1 + $0x108] sm:$0xff]  ;;  %v44_v34 = vld [vmem:[%s503_s1 + $0xd0] sm:$0xff]  ;;  %v45_v35 = vld [vmem:[%s503_s1 + $0xd8] sm:$0xff] }
   0xd   :  { %97 = vmatpush.msra.mxu0 %v58_v24  ;;  %126 = vmatpush.msra.mxu1 %v59_v25  ;;  %v46_v36 = vld [vmem:[%s503_s1 + $0xe0] sm:$0xff]  ;;  %v47_v37 = vld [vmem:[%s503_s1 + $0xe8] sm:$0xff]  ;;  %v40_v38 = vld [vmem:[%s503_s1 + $0xb0] sm:$0xff] }
   0xe   :  { %156 = vmatpush.msra.mxu2 %v56_v22  ;;  %185 = vmatpush.msra.mxu3 %v57_v23  ;;  %v41_v39 = vld [vmem:[%s503_s1 + $0xb8] sm:$0xff]  ;;  %v42_v40 = vld [vmem:[%s503_s1 + $0xc0] sm:$0xff]  ;;  %v43_v41 = vld [vmem:[%s503_s1 + $0xc8] sm:$0xff] }
   0xf   :  { %98 = vmatpush.msra.mxu0 %v54_v28  ;;  %127 = vmatpush.msra.mxu1 %v55_v29  ;;  %v36_v42 = vld [vmem:[%s503_s1 + $0x90] sm:$0xff]  ;;  %v37_v43 = vld [vmem:[%s503_s1 + $0x98] sm:$0xff]  ;;  %v38_v44 = vld [vmem:[%s503_s1 + $0xa0] sm:$0xff] }
  0x10   :  { %157 = vmatpush.msra.mxu2 %v52_v26  ;;  %186 = vmatpush.msra.mxu3 %v53_v27  ;;  %v39_v45 = vld [vmem:[%s503_s1 + $0xa8] sm:$0xff]  ;;  %v32_v46 = vld [vmem:[%s503_s1 + $0x70] sm:$0xff]  ;;  %v33_v47 = vld [vmem:[%s503_s1 + $0x78] sm:$0xff] }
  0x11   :  { %99 = vmatpush.msra.mxu0 %v50_v32  ;;  %128 = vmatpush.msra.mxu1 %v51_v33  ;;  %v34_v48 = vld [vmem:[%s503_s1 + $0x80] sm:$0xff]  ;;  %v35_v49 = vld [vmem:[%s503_s1 + $0x88] sm:$0xff]  ;;  %v28_v50 = vld [vmem:[%s503_s1 + $0x50] sm:$0xff] }
  0x12   :  { %158 = vmatpush.msra.mxu2 %v48_v30  ;;  %187 = vmatpush.msra.mxu3 %v49_v31  ;;  %v29_v51 = vld [vmem:[%s503_s1 + $0x58] sm:$0xff]  ;;  %v30_v52 = vld [vmem:[%s503_s1 + $0x60] sm:$0xff]  ;;  %v31_v53 = vld [vmem:[%s503_s1 + $0x68] sm:$0xff] }
  0x13   :  { %100 = vmatpush.msra.mxu0 %v46_v36  ;;  %129 = vmatpush.msra.mxu1 %v47_v37  ;;  %v24_v54 = vld [vmem:[%s503_s1 + $0x30] sm:$0xff]  ;;  %v25_v55 = vld [vmem:[%s503_s1 + $0x38] sm:$0xff]  ;;  %v26_v56 = vld [vmem:[%s503_s1 + $0x40] sm:$0xff] }
  0x14   :  { %159 = vmatpush.msra.mxu2 %v44_v34  ;;  %188 = vmatpush.msra.mxu3 %v45_v35  ;;  %v27_v57 = vld [vmem:[%s503_s1 + $0x48] sm:$0xff]  ;;  %v20_v58 = vld [vmem:[%s503_s1 + $0x10] sm:$0xff]  ;;  %v21_v59 = vld [vmem:[%s503_s1 + $0x18] sm:$0xff] }
  0x15   :  { %101 = vmatpush.msra.mxu0 %v42_v40  ;;  %130 = vmatpush.msra.mxu1 %v43_v41  ;;  %v14_v60 = vld [vmem:[%s504_s0] sm:$0xff]  ;;  %v23_v62 = vld [vmem:[%s503_s1 + $0x28] sm:$0xff]  ;;  %v16_v2 = vld [vmem:[%s504_s0 + $0x10] sm:$0xff] }
  0x16   :  { %160 = vmatpush.msra.mxu2 %v40_v38  ;;  %189 = vmatpush.msra.mxu3 %v41_v39  ;;  %v22_v61 = vld [vmem:[%s503_s1 + $0x20] sm:$0xff]  ;;  %v19_v0 = vld [vmem:[%s503_s1 + $0x8] sm:$0xff]  ;;  %v17_v3 = vld [vmem:[%s504_s0 + $0x18] sm:$0x1] }
  0x17   :  { %102 = vmatpush.msra.mxu0 %v38_v44  ;;  %131 = vmatpush.msra.mxu1 %v39_v45  ;;  %v18_v63 = vld [vmem:[%s503_s1] sm:$0xff]  ;;  %v15_v1 = vld [vmem:[%s504_s0 + $0x8] sm:$0xff] }
  0x18   :  { %161 = vmatpush.msra.mxu2 %v36_v42  ;;  %190 = vmatpush.msra.mxu3 %v37_v43  ;;  %v82_v4 = vld [vmem:[%s505_s2] sm:$0xf] }
  0x19   :  { %103 = vmatpush.msra.mxu0 %v34_v48  ;;  %132 = vmatpush.msra.mxu1 %v35_v49  ;;  %v84_v5 = vperm.slane %v82_v4, 0  ;;  %v85_v6 = vperm.slane %v82_v4, 1  ;;  %v86_v7 = vperm.slane %v82_v4, 2  ;;  %v87_v8 = vperm.slane %v82_v4, 3 }
  0x1a   :  { %162 = vmatpush.msra.mxu2 %v32_v46  ;;  %191 = vmatpush.msra.mxu3 %v33_v47 }
  0x1b   :  { %104 = vmatpush.msra.mxu0 %v30_v52  ;;  %133 = vmatpush.msra.mxu1 %v31_v53 }
  0x1c   :  { %163 = vmatpush.msra.mxu2 %v28_v50  ;;  %192 = vmatpush.msra.mxu3 %v29_v51 }
  0x1d   :  { %105 = vmatpush.msra.mxu0 %v26_v56  ;;  %134 = vmatpush.msra.mxu1 %v27_v57 }
  0x1e   :  { %164 = vmatpush.msra.mxu2 %v24_v54  ;;  %193 = vmatpush.msra.mxu3 %v25_v55 }
  0x1f   :  { %106 = vmatpush.msra.mxu0 %v22_v61  ;;  %135 = vmatpush.msra.mxu1 %v23_v62 }
  0x20   :  { %165 = vmatpush.msra.mxu2 %v20_v58  ;;  %194 = vmatpush.msra.mxu3 %v21_v59 }
  0x21   :  { %166 = vmatmul.f32.vlgmr.msra.gmra.mxu2 %v14_v60  ;;  %195 = vmatmul.f32.vlgmr.msra.gmra.mxu3 %v14_v60 }
  0x22   :  { %107 = vmatpush.msra.mxu0 %v18_v63  ;;  %136 = vmatpush.msra.mxu1 %v19_v0 }
  0x23   :  { %108 = vmatmul.f32.vlgmr.msra.gmra.mxu0 %v14_v60  ;;  %137 = vmatmul.f32.vlgmr.msra.gmra.mxu1 %v14_v60 }
  0x29   :  { %169 = vmatmul.f32.gmra.mxu2 %v15_v1  ;;  %198 = vmatmul.f32.gmra.mxu3 %v15_v1 }
  0x2b   :  { %111 = vmatmul.f32.gmra.mxu0 %v15_v1  ;;  %140 = vmatmul.f32.gmra.mxu1 %v15_v1 }
  0x31   :  { %172 = vmatmul.f32.gmra.mxu2 %v16_v2  ;;  %201 = vmatmul.f32.gmra.mxu3 %v16_v2 }
  0x33   :  { %114 = vmatmul.f32.gmra.mxu0 %v16_v2  ;;  %143 = vmatmul.f32.gmra.mxu1 %v16_v2 }
  0x39   :  { %175 = vmatmul.f32.gmra.mxu2 %v17_v3  ;;  %204 = vmatmul.f32.gmra.mxu3 %v17_v3 }
  0x3b   :  { %117 = vmatmul.f32.gmra.mxu0 %v17_v3  ;;  %146 = vmatmul.f32.gmra.mxu1 %v17_v3 }
  0xa0   :  { %v109_v9 = vpop.f32.mrf.mxu0  ;;  %v138_v10 = vpop.f32.mrf.mxu1 }
  0xa1   :  { %v110_v11 = vadd.f32 %v109_v9, %v84_v5  ;;  %v139_v12 = vadd.f32 %v138_v10, %v85_v6 }
  0xa3   :  { %208 = vst [vmem:[%s506_s3] sm:$0xff] %v110_v11 }
  0xa4   :  { %v167_v13 = vpop.f32.mrf.mxu2  ;;  %v196_v14 = vpop.f32.mrf.mxu3  ;;  %209 = vst [vmem:[%s506_s3 + $0x8] sm:$0xff] %v139_v12 }
  0xa5   :  { %v168_v15 = vadd.f32 %v167_v13, %v86_v7  ;;  %v197_v16 = vadd.f32 %v196_v14, %v87_v8 }
  0xa7   :  { %210 = vst [vmem:[%s506_s3 + $0x10] sm:$0xff] %v168_v15 }
  0xa8   :  { %211 = vst [vmem:[%s506_s3 + $0x18] sm:$0xff] %v197_v16  ;;  %v112_v17 = vpop.f32.mrf.mxu0  ;;  %v141_v18 = vpop.f32.mrf.mxu1 }
  0xa9   :  { %v113_v19 = vadd.f32 %v112_v17, %v84_v5  ;;  %v142_v20 = vadd.f32 %v141_v18, %v85_v6 }
  0xab   :  { %212 = vst [vmem:[%s506_s3 + $0x20] sm:$0xff] %v113_v19 }
  0xac   :  { %v170_v21 = vpop.f32.mrf.mxu2  ;;  %v199_v22 = vpop.f32.mrf.mxu3  ;;  %213 = vst [vmem:[%s506_s3 + $0x28] sm:$0xff] %v142_v20 }
  0xad   :  { %v171_v23 = vadd.f32 %v170_v21, %v86_v7  ;;  %v200_v24 = vadd.f32 %v199_v22, %v87_v8 }
  0xaf   :  { %214 = vst [vmem:[%s506_s3 + $0x30] sm:$0xff] %v171_v23 }
  0xb0   :  { %215 = vst [vmem:[%s506_s3 + $0x38] sm:$0xff] %v200_v24  ;;  %v115_v25 = vpop.f32.mrf.mxu0  ;;  %v144_v26 = vpop.f32.mrf.mxu1 }
  0xb1   :  { %v116_v27 = vadd.f32 %v115_v25, %v84_v5  ;;  %v145_v28 = vadd.f32 %v144_v26, %v85_v6 }
  0xb3   :  { %216 = vst [vmem:[%s506_s3 + $0x40] sm:$0xff] %v116_v27 }
  0xb4   :  { %v173_v29 = vpop.f32.mrf.mxu2  ;;  %v202_v30 = vpop.f32.mrf.mxu3  ;;  %217 = vst [vmem:[%s506_s3 + $0x48] sm:$0xff] %v145_v28 }
  0xb5   :  { %v174_v31 = vadd.f32 %v173_v29, %v86_v7  ;;  %v203_v32 = vadd.f32 %v202_v30, %v87_v8 }
  0xb7   :  { %218 = vst [vmem:[%s506_s3 + $0x50] sm:$0xff] %v174_v31 }
  0xb8   :  { %219 = vst [vmem:[%s506_s3 + $0x58] sm:$0xff] %v203_v32  ;;  %v118_v33 = vpop.f32.mrf.mxu0  ;;  %v147_v34 = vpop.f32.mrf.mxu1 }
  0xb9   :  { %v119_v35 = vadd.f32 %v118_v33, %v84_v5  ;;  %v148_v36 = vadd.f32 %v147_v34, %v85_v6 }
  0xbb   :  { %220 = vst [vmem:[%s506_s3 + $0x60] sm:$0x1] %v119_v35 }
  0xbc   :  { %v176_v37 = vpop.f32.mrf.mxu2  ;;  %v205_v38 = vpop.f32.mrf.mxu3  ;;  %221 = vst [vmem:[%s506_s3 + $0x68] sm:$0x1] %v148_v36 }
  0xbd   :  { %v177_v39 = vadd.f32 %v176_v37, %v86_v7  ;;  %v206_v40 = vadd.f32 %v205_v38, %v87_v8 }
  0xbf   :  { %222 = vst [vmem:[%s506_s3 + $0x70] sm:$0x1] %v177_v39 }
  0xc0   :  { %223 = vst [vmem:[%s506_s3 + $0x78] sm:$0x1] %v206_v40 }

</bundles_post_ra>
